<compile_context>
chip_gen: v7x
topology: tpu7x:2x2x1
jax: 0.10.0
libtpu: 0.0.40
codegen_flags: <defaults>
</compile_context>

<pallas_src>
import jax
import jax.numpy as jnp
from jax.experimental import pallas as pl
from jax.experimental.pallas import tpu as pltpu

HIDDEN = (64, 32)
BN_EPS = 1e-5

# Layout inside the packed (64, 128) parameter array.
#   rows 0:32, cols 0:64  -> W2' (32, 64)   (BN1 folded in)
#   row 32,   cols 0:32  -> w3' (1, 32)    (BN2 folded in, stored as a row)
#   col 64,   rows 0:64  -> w1  (64,)
#   col 65,   rows 0:64  -> b1  (64,)
#   col 66,   rows 0:32  -> b2' (32,)
#   row 0,    col 67     -> b3' scalar
_W3_ROW = 32
_W1_COL = 64
_B1_COL = 65
_B2_COL = 66
_B3_COL = 67


def featurenet_kernel(x_ref, p_ref, o_ref):
    """One (1, TB) lane-dense batch tile through the whole (BN-folded) MLP.

    The tile is processed in 256-lane column chunks so the (64,c)/(32,c)
    intermediates live in vregs; each chunk uses three MXU matmuls.
    """
    TB = x_ref.shape[1]
    chunk = 256 if TB % 256 == 0 else 128          # TB is always a multiple of 128
    n_chunks = TB // chunk

    p = p_ref[...]                                  # (64, 128) packed params
    w1 = p[:, _W1_COL:_W1_COL + 1]                  # (64, 1)
    b1 = p[:, _B1_COL:_B1_COL + 1]                  # (64, 1)
    w2 = p[0:32, 0:64]                              # (32, 64)
    b2 = p[0:32, _B2_COL:_B2_COL + 1]               # (32, 1)
    w3 = p[_W3_ROW:_W3_ROW + 1, 0:32]               # (1, 32)  row layout
    b3 = p[0:1, _B3_COL:_B3_COL + 1]                # (1, 1)

    for c in range(n_chunks):                       # static slices: zero-cost views
        lo = c * chunk
        xc = x_ref[:, lo:lo + chunk]                # (1, chunk) batch on lanes

        # Layer 1: Linear(1->64)+ReLU as a rank-1 outer product on the MXU.
        h1 = jnp.maximum(
            jnp.dot(w1, xc, preferred_element_type=jnp.float32) + b1, 0.0)   # (64, chunk)

        # Layer 2: Linear(64->32)+ReLU (BN1 folded into w2/b2) on the MXU.
        h2 = jnp.maximum(
            jnp.dot(w2, h1, preferred_element_type=jnp.float32) + b2, 0.0)   # (32, chunk)

        # Head: Linear(32->1) (BN2 folded into w3/b3) on the MXU, lane-dense out.
        o_ref[:, lo:lo + chunk] = (
            jnp.dot(w3, h2, preferred_element_type=jnp.float32) + b3)        # (1, chunk)


def fold_and_pack_params(raw_params):
    """Fold eval-mode BatchNorms into the following Linears and pack everything
    into a single (64, 128) f32 array (one DMA for all parameters)."""
    (W1, b1, g1, be1, m1, v1,
     W2, b2, g2, be2, m2, v2,
     W3, b3) = raw_params                            # torch (out,in) layout

    scale1 = g1 * jax.lax.rsqrt(v1 + BN_EPS)         # (64,)
    shift1 = be1 - m1 * scale1                       # (64,)
    scale2 = g2 * jax.lax.rsqrt(v2 + BN_EPS)         # (32,)
    shift2 = be2 - m2 * scale2                       # (32,)

    w1_col = W1.reshape(HIDDEN[0])                   # (64,)  Linear(1,64) weight
    b1_col = b1                                      # (64,)

    W2f = W2 * scale1[None, :]                       # (32, 64)
    b2f = W2 @ shift1 + b2                           # (32,)

    W3f = W3 * scale2[None, :]                       # (1, 32)
    b3f = W3 @ shift2 + b3                           # (1,)

    packed = jnp.zeros((64, 128), jnp.float32)
    packed = packed.at[0:32, 0:64].set(W2f)
    packed = packed.at[_W3_ROW, 0:32].set(W3f[0])
    packed = packed.at[:, _W1_COL].set(w1_col)
    packed = packed.at[:, _B1_COL].set(b1_col)
    packed = packed.at[0:32, _B2_COL].set(b2f)
    packed = packed.at[0, _B3_COL].set(b3f[0])
    return packed


def featurenet_forward(x, packed_params, *, tb=8192):
    """x: (B,) f32. packed_params: (64,128) from fold_and_pack_params.
    Returns (B, 1) matching the torch module's output."""
    assert tb % 128 == 0
    B = x.shape[0]
    b_lane = pl.cdiv(max(B, 1), 128) * 128           # round batch up to lane multiple

    TB = min(tb, b_lane)
    # Keep >=2 parallel tiles when the batch allows it so both v7x TensorCores
    # get work; the extra grid step is noise on single-TC v5e/v6e.
    if TB == b_lane and b_lane >= 256 and (b_lane // 2) % 128 == 0:
        TB = b_lane // 2
    B_pad = pl.cdiv(b_lane, TB) * TB
    n_tiles = B_pad // TB

    # Batch on the lane axis: (1, B_pad). Skip the pad-copy when not needed.
    xf = x.astype(jnp.float32).reshape(1, B)
    x_row = xf if B == B_pad else jnp.pad(xf, ((0, 0), (0, B_pad - B)))

    out_row = pl.pallas_call(
        featurenet_kernel,
        out_shape=jax.ShapeDtypeStruct((1, B_pad), jnp.float32),
        grid_spec=pltpu.PrefetchScalarGridSpec(
            num_scalar_prefetch=0,
            grid=(n_tiles,),
            in_specs=[
                pl.BlockSpec((1, TB), lambda i: (0, i)),       # lane-dense input
                pl.BlockSpec((64, 128), lambda i: (0, 0)),     # packed params (1 DMA)
            ],
            out_specs=pl.BlockSpec((1, TB), lambda i: (0, i)), # lane-dense output
        ),
        compiler_params=pltpu.CompilerParams(
            dimension_semantics=("parallel",)),
    )(x_row, packed_params)

    out_col = out_row.reshape(B_pad, 1)
    return out_col if B == B_pad else out_col[:B]


def init_raw_params(key):
    """Deterministic synthetic parameters in torch (out_features, in_features) layout."""
    ks = jax.random.split(key, 16)
    f32 = jnp.float32

    def bn(k, units):
        k1, k2, k3, k4 = jax.random.split(k, 4)
        gamma = 1.0 + 0.1 * jax.random.normal(k1, (units,), f32)
        beta = 0.1 * jax.random.normal(k2, (units,), f32)
        mean = 0.1 * jax.random.normal(k3, (units,), f32)
        var = 1.0 + 0.05 * jax.random.uniform(k4, (units,), f32)
        return gamma, beta, mean, var

    W1 = 0.5 * jax.random.normal(ks[0], (HIDDEN[0], 1), f32)
    b1 = 0.1 * jax.random.normal(ks[1], (HIDDEN[0],), f32)
    g1, be1, m1, v1 = bn(ks[2], HIDDEN[0])

    W2 = 0.2 * jax.random.normal(ks[3], (HIDDEN[1], HIDDEN[0]), f32)
    b2 = 0.1 * jax.random.normal(ks[4], (HIDDEN[1],), f32)
    g2, be2, m2, v2 = bn(ks[5], HIDDEN[1])

    W3 = 0.2 * jax.random.normal(ks[6], (1, HIDDEN[1]), f32)
    b3 = 0.1 * jax.random.normal(ks[7], (1,), f32)

    return [W1, b1, g1, be1, m1, v1,
            W2, b2, g2, be2, m2, v2,
            W3, b3]


def reference_forward(x, raw_params):
    """Plain-JAX eval-mode reference of the original (un-folded) module."""
    (W1, b1, g1, be1, m1, v1,
     W2, b2, g2, be2, m2, v2,
     W3, b3) = raw_params
    h = x.reshape(-1, 1) @ W1.T + b1
    h = jnp.maximum(h, 0.0)
    h = (h - m1) * jax.lax.rsqrt(v1 + BN_EPS) * g1 + be1
    h = h @ W2.T + b2
    h = jnp.maximum(h, 0.0)
    h = (h - m2) * jax.lax.rsqrt(v2 + BN_EPS) * g2 + be2
    return h @ W3.T + b3


if __name__ == "__main__":
    key = jax.random.PRNGKey(0)
    k_x, k_p = jax.random.split(key)

    raw_params = init_raw_params(k_p)
    packed = fold_and_pack_params(raw_params)

    # B=256: no padding, 2 parallel (1,128) tiles (exercises the megacore split).
    # B=100: lane padding + tail slice path, single tile.
    for B in (256, 100):
        xb = jax.random.normal(jax.random.fold_in(k_x, B), (B,), jnp.float32)
        out = jax.block_until_ready(featurenet_forward(xb, packed))
        ref = reference_forward(xb, raw_params)
        assert out.shape == (B, 1)
        max_err = float(jnp.max(jnp.abs(out - ref)))
        assert jnp.allclose(out, ref, atol=2e-4, rtol=2e-4), max_err

    print("KERNEL_OK")
</pallas_src>

<mosaic_0001>
module attributes {stable_mosaic.version = 11 : i64} {
  func.func @featurenet_kernel(%arg0: i32, %arg1: memref<1x128xf32, #tpu.memory_space<vmem>>, %arg2: memref<64x128xf32, #tpu.memory_space<vmem>>, %arg3: memref<1x128xf32, #tpu.memory_space<vmem>>) attributes {dimension_semantics = [#tpu.dimension_semantics<parallel>], iteration_bounds = array<i64: 2>, scalar_prefetch = 0 : i64, scratch_operands = 0 : i64, tpu.core_type = #tpu.core_type<tc>, window_params = [{transform_indices = @transform_0, window_bounds = array<i64: 1, 128>}, {pipeline_mode = #tpu.pipeline_mode<synchronous>, transform_indices = @transform_1, window_bounds = array<i64: 64, 128>}, {transform_indices = @transform_2, window_bounds = array<i64: 1, 128>}]} {
    %c0 = arith.constant 0 : index
    %c0_0 = arith.constant 0 : index
    %0 = vector.load %arg2[%c0, %c0_0] : memref<64x128xf32, #tpu.memory_space<vmem>>, vector<64x128xf32>
    %1 = vector.extract_strided_slice %0 {offsets = [0, 64], sizes = [64, 1], strides = [1, 1]} : vector<64x128xf32> to vector<64x1xf32>
    %2 = vector.extract_strided_slice %0 {offsets = [0, 65], sizes = [64, 1], strides = [1, 1]} : vector<64x128xf32> to vector<64x1xf32>
    %3 = vector.extract_strided_slice %0 {offsets = [0, 0], sizes = [32, 64], strides = [1, 1]} : vector<64x128xf32> to vector<32x64xf32>
    %4 = vector.extract_strided_slice %0 {offsets = [0, 66], sizes = [32, 1], strides = [1, 1]} : vector<64x128xf32> to vector<32x1xf32>
    %5 = vector.extract_strided_slice %0 {offsets = [32, 0], sizes = [1, 32], strides = [1, 1]} : vector<64x128xf32> to vector<1x32xf32>
    %6 = vector.extract_strided_slice %0 {offsets = [0, 67], sizes = [1, 1], strides = [1, 1]} : vector<64x128xf32> to vector<1x1xf32>
    %c0_1 = arith.constant 0 : index
    %c0_2 = arith.constant 0 : index
    %7 = vector.load %arg1[%c0_1, %c0_2] : memref<1x128xf32, #tpu.memory_space<vmem>>, vector<1x128xf32>
    %cst = arith.constant dense<0.000000e+00> : vector<64x128xf32>
    %8 = tpu.matmul %1, %7, %cst {dimension_numbers = #tpu.dot_dimension_numbers<[1], [0], [0], [1], [0, 0, 1, 1], [], []>} : vector<64x1xf32>, vector<1x128xf32>, vector<64x128xf32> -> vector<64x128xf32>
    %9 = vector.broadcast %2 : vector<64x1xf32> to vector<64x128xf32>
    %10 = arith.addf %8, %9 : vector<64x128xf32>
    %cst_3 = arith.constant 0.000000e+00 : f32
    %11 = vector.broadcast %cst_3 : f32 to vector<64x128xf32>
    %12 = arith.maximumf %10, %11 : vector<64x128xf32>
    %cst_4 = arith.constant dense<0.000000e+00> : vector<32x128xf32>
    %13 = tpu.matmul %3, %12, %cst_4 {dimension_numbers = #tpu.dot_dimension_numbers<[1], [0], [0], [1], [0, 0, 1, 1], [], []>} : vector<32x64xf32>, vector<64x128xf32>, vector<32x128xf32> -> vector<32x128xf32>
    %14 = vector.broadcast %4 : vector<32x1xf32> to vector<32x128xf32>
    %15 = arith.addf %13, %14 : vector<32x128xf32>
    %cst_5 = arith.constant 0.000000e+00 : f32
    %16 = vector.broadcast %cst_5 : f32 to vector<32x128xf32>
    %17 = arith.maximumf %15, %16 : vector<32x128xf32>
    %cst_6 = arith.constant dense<0.000000e+00> : vector<1x128xf32>
    %18 = tpu.matmul %5, %17, %cst_6 {dimension_numbers = #tpu.dot_dimension_numbers<[1], [0], [0], [1], [0, 0, 1, 1], [], []>} : vector<1x32xf32>, vector<32x128xf32>, vector<1x128xf32> -> vector<1x128xf32>
    %19 = vector.broadcast %6 : vector<1x1xf32> to vector<1x128xf32>
    %20 = arith.addf %18, %19 : vector<1x128xf32>
    %c0_7 = arith.constant 0 : index
    %c0_8 = arith.constant 0 : index
    %21 = vector.load %arg3[%c0_7, %c0_8] : memref<1x128xf32, #tpu.memory_space<vmem>>, vector<1x128xf32>
    tpu.vector_store %arg3[%c0_7, %c0_8], %20 {strides = array<i32>} : memref<1x128xf32, #tpu.memory_space<vmem>>, vector<1x128xf32>,
    return
  }
  func.func @transform_0(%arg0: i32) -> (i32, i32) {
    %c0_i32 = arith.constant 0 : i32
    %c0_i32_0 = arith.constant 0 : i32
    return %c0_i32, %arg0 : i32, i32
  }
  func.func @transform_1(%arg0: i32) -> (i32, i32) {
    %c0_i32 = arith.constant 0 : i32
    %c0_i32_0 = arith.constant 0 : i32
    %c0_i32_1 = arith.constant 0 : i32
    return %c0_i32, %c0_i32_0 : i32, i32
  }
  func.func @transform_2(%arg0: i32) -> (i32, i32) {
    %c0_i32 = arith.constant 0 : i32
    %c0_i32_0 = arith.constant 0 : i32
    return %c0_i32, %arg0 : i32, i32
  }
}

</mosaic_0001>

<bundles_post_ra>
// kernel: tpu_custom_call.1
= control target key start
LH: loop header
LB: loop body
LE: loop exit
PB: predicated region body
PF: predicated region fallthrough
CT: control target
= control target key end

     0   :  { %7 = vsyncpa [#allocation3], 0  ;;  %s1233_s0 = inlined_call_operand.hbm [shape: f32[1,256], index: 0, kind: input, shape index: {}]   ;;  %s1234_s1 = inlined_call_operand.hbm [shape: f32[64,128], index: 1, kind: input, shape index: {}]   ;;  %s1235_s2 = inlined_call_operand.hbm [shape: f32[1,256], index: 2, kind: output, shape index: {}]  }
   0x1   :  { %9 = vsyncpa [#allocation3 + $0x1], 0 }
   0x2   :  { %10 = vsyncpa [#allocation6], 0 }
   0x3   :  { %11 = vsyncpa [#allocation4], 0 }
   0x4   :  { %13 = vsyncpa [#allocation4 + $0x1], 0  ;;  %s994_s9 = smov 0   ;;  %s996_s10 = smov 0  }
   0x5   :  { %s998_s11 = smov 0   ;;  %s1000_s12 = smov 0  }
   0x6 LB: > { %s1015_s13 = sadd.s32 4294967295, %s965_s12   ;;  %s647_s14 = sadd.s32 4294967294, %s965_s12   ;;  %s965_s12 = sphi %s1000_s12, %s1255_s12   ;;  %s961_s11 = sphi %s998_s11, %s1254_s11   ;;  %s957_s10 = sphi %s996_s10, %s1253_s10   ;;  %s953_s9 = sphi %s994_s9, %s1252_s9  }
   0x7   : > { %p39_p0 = scmp.ne.s32.totalorder %s957_s10, %s953_s9  ;;  %p1236_p1 = scmp.eq.s32.totalorder %s1015_s13, 0 }
   0x8   : > { %p90_p3 = scmp.eq.s32.totalorder %s647_s14, 1  ;;  %p648_p5 = scmp.ge.s32.totalorder %s965_s12, 1 }
   0x9   : > { %p1024_p4 = por %p1236_p1, %p39_p0  ;;  %p97_p7 = scmp.lt.s32.totalorder %s965_s12, 3 }
   0xa   : > { %p1029_p6 = por %p90_p3, %p39_p0  ;;  %s967_s18 = smov [#allocation5]  }
   0xb   : > { %s1239_s15 = scalar_select %p1024_p4, 1, 0 }
   0xc   : > { %s1240_s16 = scalar_select %p1029_p6, 1, 0 }
   0xd   : > { %p1034_p8 = pnand %p648_p5, %p97_p7  ;;  %s109_s19 = sshll.u32 %s967_s18, 4  ;;  %s1038_s19 = int_to_ptr.vmem [resolvable:$true] %s109_s19 }
   0xe   : > { %s1050_s21 = sadd.s32 1, %s965_s12   ;;  %s26_s22 = sadd.s32 1, %s961_s11 }
   0xf   : > { %s1241_s17 = scalar_select %p1034_p8, 1, 0 }
  0x10   : > { %p774_p9 = pneg %p1034_p8  ;;  %s23_s23 = ssub.s32 %s965_s12, %s1050_s21 }
  0x11   : > { %s837_s26 = scalar_lea.hbm %s1234_s1, 1024 }
  0x12   : > { %p1045_p11 = pnand %p774_p9, %p1236_p1  ;;  %p838_p12 = scmp.ne.s32.totalorder %s1234_s1, %s837_s26 }
  0x13   : > { %p844_p5 = scmp.lt.u32.totalorder %s837_s26, %s1234_s1 }
  0x14   : > { %p839_p13 = pneg %p1045_p11 }
  0x16   : > { %p840_p0 = pnand %p839_p13, %p838_p12 }
  0x18   : > { %p841_p3 = pneg %p840_p0 }
  0x1a   : > { %p846_p7 = pnand %p844_p5, %p841_p3 }
  0x1c   : > { %849 = shalt.err (!%p846_p7)
}
  0x1d   : > { %s850_s3 = scalar_lea.vmem %s1038_s19, 1024  ;;  %p858_p2 = scmp.lt.s32.totalorder %s1038_s19, %s1038_s19 }
  0x1e   : > { %p851_p9 = scmp.ne.s32.totalorder %s1038_s19, %s850_s3  ;;  %p859_p6 = scmp.lt.s32.totalorder %s850_s3, %s850_s3 }
  0x20   : > { %p853_p10 = pnand %p851_p9, %p839_p13  ;;  %p860_p4 = por %p859_p6, %p858_p2 }
  0x22   : > { %p854_p1 = pneg %p853_p10 }
  0x24   : > { %p861_p8 = pnand %p860_p4, %p854_p1 }
  0x26   : > { %864 = shalt.err (!%p861_p8)
}
  0x27   : > { %s968_s4 = smov 128   ;;  %s969_s5 = smov 8  }
  0x28   : > { %777 = dma.hbm_to_vmem [thread:$0]  (!%p1045_p11), %s1234_s1, 1024, %s1038_s19, [#allocation6], %s968_s4, %s968_s4, %s969_s5  }
  0x29   : > { %p24_p2 = scmp.eq.s32.totalorder %s23_s23, 0  ;;  %p33_p1 = scmp.ne.s32.totalorder %s961_s11, %s957_s10 }
  0x2a   : > { %p34_p4 = scmp.eq.s32.totalorder %s965_s12, 0  ;;  %p787_p6 = scmp.lt.s32.totalorder %s965_s12, 2 }
  0x2b   : > { %s1081_s8 = scalar_select %p24_p2, %s961_s11, %s26_s22  }
  0x2c   : > { %p35_p8 = por %p34_p4, %p33_p1  ;;  %p1243_p10 = scmp.eq.s32.totalorder %s1015_s13, 1 }
  0x2d   : > { %s123_s18 = sand.u32 1, %s961_s11   ;;  %s651_s24 = sshll.u32 %s965_s12, 4 }
  0x2e   : > { %p1085_p12 = por %p1243_p10, %p33_p1  ;;  %s1094_s26 = scalar_lea.hbm %s1233_s0, %s651_s24 }
  0x2f   : > { %s126_s19 = scalar_lea.vmem [#allocation2], %s123_s18  ;;  %p1098_p11 = pnand %p787_p6, %p35_p8 }
  0x30   : > { %s133_s22 = sshll.u32 %s126_s19, 4  ;;  %s124_s27 = scalar_lea.sflag [#allocation3], %s123_s18  ;;  %s1096_s22 = int_to_ptr.vmem [resolvable:$true] %s133_s22 }
  0x31   : > { %s865_s28 = scalar_lea.hbm %s1094_s26, 16  ;;  %p867_p0 = pneg %p1098_p11 }
  0x32   : > { %p866_p13 = scmp.ne.s32.totalorder %s1094_s26, %s865_s28  ;;  %s870_s3 = scalar_lea.hbm %s1233_s0, 32 }
  0x33   : > { %p871_p7 = scmp.lt.u32.totalorder %s1094_s26, %s1233_s0  ;;  %p872_p9 = scmp.lt.u32.totalorder %s870_s3, %s865_s28 }
  0x34   : > { %p868_p3 = pnand %p867_p0, %p866_p13  ;;  %p874_p1 = scmp.lt.u32.totalorder %s865_s28, %s1094_s26 }
  0x35   : > { %p873_p2 = por %p872_p9, %p871_p7 }
  0x36   : > { %p869_p5 = pneg %p868_p3 }
  0x37   : > { %p875_p4 = por %p874_p1, %p873_p2 }
  0x39   : > { %p876_p6 = pnand %p875_p4, %p869_p5 }
  0x3b   : > { %879 = shalt.err (!%p876_p6)
}
  0x3c   : > { %s880_s6 = scalar_lea.vmem %s1096_s22, 16  ;;  %s970_s7 = smov [#allocation2]  }
  0x3d   : > { %p881_p8 = scmp.ne.s32.totalorder %s1096_s22, %s880_s6  ;;  %s885_s18 = sshll.u32 %s970_s7, 4  ;;  %s886_s18 = int_to_ptr.vmem [resolvable:$false] %s885_s18 }
  0x3e   : > { %s887_s24 = scalar_lea.vmem %s886_s18, 32  ;;  %p888_p3 = scmp.lt.s32.totalorder %s1096_s22, %s886_s18 }
  0x3f   : > { %p883_p10 = pnand %p881_p8, %p867_p0  ;;  %p889_p7 = scmp.lt.s32.totalorder %s887_s24, %s880_s6 }
  0x41   : > { %p884_p13 = pneg %p883_p10  ;;  %p890_p9 = por %p889_p7, %p888_p3 }
  0x43   : > { %p891_p2 = pnand %p890_p9, %p884_p13 }
  0x45   : > { %894 = shalt.err (!%p891_p2)
}
  0x46   : > { %781 = dma.hbm_to_vmem [thread:$0]  (!%p1098_p11), %s1094_s26, 16, %s1096_s22, %s124_s27  }
  0x47   : > { %p1246_p5 = scmp.ne.s32.totalorder %s1241_s17, 0 }
  0x48   : > { %s1130_s25 = sand.u32 (!%p1246_p5), 1, %s957_s10   ;;  %p1247_p0 = scmp.ne.s32.totalorder (!%p1246_p5), %s1239_s15, 0 }
  0x49   : > { %142 = sbr.rel (%p1246_p5) target bundleno = 893 (0x37d), region = 28  ;;  %s145_s20 = scalar_lea.sflag (!%p1246_p5), [#allocation3], %s1130_s25 }
  0x4a   : > { %s147_s19 = scalar_lea.vmem (!%p1246_p5), [#allocation2], %s1130_s25 }
  0x50   : > { %940 = dma.done.wait (%p1247_p0), %s145_s20, 16  }
  0x51   : > { %942 = vsyncadd (%p1247_p0), %s145_s20, 4294967280  ;;  %p1248_p1 = scmp.eq.s32.totalorder %s1015_s13, 0 }
  0x53   : > { %944 = dma.done.wait (%p1248_p1), [#allocation6], 1024   ;;  %p1249_p11 = pmov %p1248_p1 }
  0x54   : > { %v1142_v0 = vld [vmem:[#allocation5] sm:$0xff]  ;;  %v1144_v1 = vld [vmem:[#allocation5 + $0x10] sm:$0xff]  ;;  %vm252_vm0 = vcmask 1040384   ;;  %s971_s17 = smov 64   ;;  %v1148_v2 = vld [vmem:[#allocation5 + $0x8] sm:$0xff]  ;;  %v972_v7 = vmov 65  }
  0x55   : > { %946 = vsyncadd (%p1249_p11), [#allocation6], 4294966272  ;;  %219 = vrot.lane.b32.xlu0 %v1142_v0, %s971_s17  ;;  %223 = vrot.lane.b32.xlu1 %v1144_v1, %s971_s17  ;;  %v1150_v3 = vld [vmem:[#allocation5 + $0x18] sm:$0xff]  ;;  %v1154_v5 = vld [vmem:[#allocation5 + $0x20] sm:$0xff]  ;;  %vm235_vm1 = vcmask 7168   ;;  %vm385_vm2 = vcmask 523264  }
  0x56   : > { %v178_v4 = vld [vmem:[%s147_s19] sm:$0x1]  ;;  %v175_v6 = vld [vmem:[#allocation5 + $0x28] sm:$0xff]  ;;  %833 = vset.pattern.permute.xlu1 %v972_v7  ;;  %832 = vset.pattern.permute.xlu0 %v972_v7  ;;  %v176_v8 = vld [vmem:[#allocation5 + $0x30] sm:$0xff]  ;;  %v973_v18 = vmov 66   ;;  %v974_v55 = vmov 0.0|0.0  }
  0x57   : > { %697 = vmatprep.subr.msk.mxu0 %vm252_vm0, %v178_v4  ;;  %v177_v9 = vld [vmem:[#allocation5 + $0x38] sm:$0xff]  ;;  %727 = vmatprep.mubr.msk.f32.mxu1 %vm385_vm2, %v1142_v0  ;;  %vm975_vm3 = vmmov 0   ;;  %v976_v56 = vmov 0.0   ;;  %v977_v57 = vmov 67   ;;  %vm487_vm4 = vcmask 261120   ;;  %s668_s15 = sshll.u32 %s1015_s13, 4 }
  0x58   : > { %698 = vmatpush3.msk.msra.mxu0 %vm252_vm0, %v178_v4  ;;  %s169_s26 = scalar_lea.vmem [#allocation7], %s1130_s25  ;;  %s1189_s28 = scalar_lea.hbm %s1235_s2, %s668_s15 }
  0x59   : > { %221 = vrot.lane.b32.xlu0 %v1148_v2, %s971_s17  ;;  %225 = vrot.lane.b32.xlu1 %v1150_v3, %s971_s17  ;;  %s574_s22 = sshll.u32 %s169_s26, 4  ;;  %s562_s29 = scalar_lea.sflag [#allocation4], %s1130_s25  ;;  %s1191_s22 = int_to_ptr.vmem [resolvable:$true] %s574_s22 }
  0x5a   : > { %760 = vmatprep.subr.bf16.mxu0 %v974_v55  ;;  %s895_s30 = scalar_lea.vmem %s1191_s22, 16  ;;  %s978_s13 = smov [#allocation7]  }
  0x5b   : > { %p896_p4 = scmp.ne.s32.totalorder %s1191_s22, %s895_s30  ;;  %s899_s3 = sshll.u32 %s978_s13, 4  ;;  %s900_s3 = int_to_ptr.vmem [resolvable:$false] %s899_s3 }
  0x5c   : > { %s901_s4 = scalar_lea.vmem %s900_s3, 32  ;;  %p902_p10 = scmp.lt.s32.totalorder %s1191_s22, %s900_s3 }
  0x5d   : > { %227 = vrot.lane.b32.xlu0 %v1154_v5, %s971_s17  ;;  %229 = vrot.lane.b32.xlu1 %v175_v6, %s971_s17  ;;  %p897_p6 = pnand %p896_p4, %p1085_p12  ;;  %p903_p13 = scmp.lt.s32.totalorder %s901_s4, %s895_s30 }
  0x5f   : > { %p898_p8 = pneg %p897_p6  ;;  %p904_p3 = por %p903_p13, %p902_p10 }
  0x61   : > { %231 = vrot.lane.b32.xlu0 %v176_v8, %s971_s17  ;;  %233 = vrot.lane.b32.xlu1 %v177_v9, %s971_s17  ;;  %p905_p7 = pnand %p904_p3, %p898_p8 }
  0x65   : > { %186 = vperm.xlu1 %833, %v1148_v2   ;;  %181 = vperm.xlu0 %832, %v1142_v0  }
  0x69   : > { %191 = vperm.xlu1 %833, %v1144_v1   ;;  %196 = vperm.xlu0 %832, %v1150_v3  }
  0x6d   : > { %201 = vperm.xlu1 %833, %v1154_v5   ;;  %206 = vperm.xlu0 %832, %v175_v6  }
  0x71   : > { %211 = vperm.xlu1 %833, %v176_v8   ;;  %216 = vperm.xlu0 %832, %v177_v9  }
  0x75   : > { %834 = vset.pattern.permute.xlu1 %v973_v18  ;;  %835 = vset.pattern.permute.xlu0 %v973_v18 }
  0x76   : > { %370 = vperm.xlu1 %834, %v1142_v0   ;;  %374 = vperm.xlu0 %835, %v1148_v2  }
  0x7a   : > { %378 = vperm.xlu1 %834, %v1144_v1   ;;  %836 = vset.pattern.permute.xlu0 %v977_v57 }
  0x7b   : > { %484 = vperm.xlu0 %836, %v1142_v0  }
  0x7e   : > { %382 = vperm.xlu1 %834, %v1150_v3  }
  0xc7   : > { %v220_v10 = vpop.permute.xlu0 %219  ;;  %v224_v11 = vpop.permute.xlu1 %223 }
  0xc8   : > { %699 = vmatprep.mubr.msk.f32.mxu0 %vm235_vm1, %v220_v10 }
  0xcb   : > { %v222_v12 = vpop.permute.xlu0 %221  ;;  %v226_v13 = vpop.permute.xlu1 %225 }
  0xcc   : > { %700 = vmatmul.mubr.msk.f32.vlgmr.msra.gmra.mrb[0].mxu0 %vm235_vm1, %v222_v12 }
  0xcd   : > { %702 = vmatprep.mubr.msk.f32.mxu0 %vm235_vm1, %v224_v11 }
  0xcf   : > { %v228_v14 = vpop.permute.xlu0 %227  ;;  %v230_v15 = vpop.permute.xlu1 %229 }
  0xd0   : > { %703 = vmatmul.mubr.msk.f32.gmra.mrb[2].mxu0 %vm235_vm1, %v226_v13 }
  0xd1   : > { %705 = vmatprep.mubr.msk.f32.mxu0 %vm235_vm1, %v228_v14 }
  0xd3   : > { %v232_v16 = vpop.permute.xlu0 %231  ;;  %v234_v17 = vpop.permute.xlu1 %233 }
  0xd4   : > { %706 = vmatmul.mubr.msk.f32.gmra.mrb[4].mxu0 %vm235_vm1, %v230_v15 }
  0xd5   : > { %708 = vmatprep.mubr.msk.f32.mxu0 %vm235_vm1, %v232_v16 }
  0xd8   : > { %709 = vmatmul.mubr.msk.f32.gmra.mrb[6].mxu0 %vm235_vm1, %v234_v17 }
  0xd9   : > { %741 = vmatprep.mubr.msk.f32.mxu0 %vm975_vm3, %v976_v56 }
  0xe4   : > { %v182_v19 = vpop.permute.xlu0 %181  ;;  %v187_v20 = vpop.permute.xlu1 %186 }
  0xe8   : > { %v197_v21 = vpop.permute.xlu0 %196  ;;  %v192_v23 = vpop.permute.xlu1 %191 }
  0xec   : > { %v207_v32 = vpop.permute.xlu0 %206  ;;  %v202_v35 = vpop.permute.xlu1 %201 }
  0xf0   : > { %v217_v44 = vpop.permute.xlu0 %216  ;;  %v212_v47 = vpop.permute.xlu1 %211 }
  0xf5   : > { %v371_v58 = vpop.permute.xlu1 %370  ;;  %v375_v60 = vpop.permute.xlu0 %374 }
  0xf9   : > { %v379_v59 = vpop.permute.xlu1 %378 }
  0xfa   : > { %v485_v13 = vpop.permute.xlu0 %484 }
  0xfd   : > { %v383_v4 = vpop.permute.xlu1 %382 }
 0x19f   : > { %v701_v22 = vpop.f32.mrb[0].mxu0 }
 0x1a0   : > { %v328_v24 = vadd.f32 %v701_v22, %v187_v20  ;;  %v322_v25 = vpop.f32.mrb[1].mxu0 }
 0x1a1   : > { %v323_v26 = vadd.f32 %v322_v25, %v182_v19 }
 0x1a2   : > { %v362_v27 = vmax.f32 %v328_v24, 0.0 }
 0x1a3   : > { %v361_v28 = vmax.f32 %v323_v26, 0.0  ;;  %v704_v29 = vpop.f32.mrb[2].mxu0 }
 0x1a4   : > { %v338_v30 = vadd.f32 %v704_v29, %v197_v21  ;;  %v332_v31 = vpop.f32.mrb[3].mxu0 }
 0x1a5   : > { %v333_v33 = vadd.f32 %v332_v31, %v192_v23  ;;  %v744_v34 = vpack.c.bf16 %v362_v27, %v361_v28 }
 0x1a6   : > { %v364_v36 = vmax.f32 %v338_v30, 0.0 }
 0x1a7   : > { %v363_v37 = vmax.f32 %v333_v33, 0.0  ;;  %v707_v38 = vpop.f32.mrb[4].mxu0  ;;  %745 = vmatprep.subr.bf16.mxu1 %v744_v34 }
 0x1a8   : > { %v348_v39 = vadd.f32 %v707_v38, %v207_v32  ;;  %v342_v40 = vpop.f32.mrb[5].mxu0  ;;  %747 = vmatpush3.bf16.msra.mxu1 %v744_v34 }
 0x1a9   : > { %v748_v41 = vpack.c.bf16 %v364_v36, %v363_v37  ;;  %v343_v42 = vadd.f32 %v342_v40, %v202_v35 }
 0x1aa   : > { %v366_v43 = vmax.f32 %v348_v39, 0.0 }
 0x1ab   : > { %v365_v45 = vmax.f32 %v343_v42, 0.0  ;;  %v710_v46 = vpop.f32.mrb[6].mxu0  ;;  %749 = vmatprep.subr.bf16.mxu1 %v748_v41 }
 0x1ac   : > { %v358_v48 = vadd.f32 %v710_v46, %v217_v44  ;;  %v352_v49 = vpop.f32.mrb[7].mxu0  ;;  %751 = vmatpush3.bf16.msra.mxu1 %v748_v41 }
 0x1ad   : > { %v752_v50 = vpack.c.bf16 %v366_v43, %v365_v45  ;;  %v353_v51 = vadd.f32 %v352_v49, %v212_v47 }
 0x1ae   : > { %v368_v52 = vmax.f32 %v358_v48, 0.0 }
 0x1af   : > { %v367_v53 = vmax.f32 %v353_v51, 0.0  ;;  %753 = vmatprep.subr.bf16.mxu1 %v752_v50 }
 0x1b0   : > { %755 = vmatpush3.bf16.msra.mxu1 %v752_v50 }
 0x1b1   : > { %v756_v54 = vpack.c.bf16 %v368_v52, %v367_v53 }
 0x1b3   : > { %757 = vmatprep.subr.bf16.mxu1 %v756_v54 }
 0x1b4   : > { %759 = vmatpush3.bf16.msra.mxu1 %v756_v54 }
 0x1b7   : > { %728 = vmatmul.mubr.msk.f32.vlgmr.msra.gmra.mrb[0].mxu1 %vm385_vm2, %v1148_v2 }
 0x1b8   : > { %730 = vmatprep.mubr.msk.f32.mxu1 %vm385_vm2, %v1144_v1 }
 0x1bb   : > { %731 = vmatmul.mubr.msk.f32.gmra.mrb[2].mxu1 %vm385_vm2, %v1150_v3 }
 0x28a   : > { %v729_v61 = vpop.f32.mrb[0].mxu1 }
 0x28b   : > { %v466_v62 = vadd.f32 %v729_v61, %v375_v60  ;;  %v460_v63 = vpop.f32.mrb[1].mxu1 }
 0x28c   : > { %v461_v2 = vadd.f32 %v460_v63, %v371_v58 }
 0x28d   : > { %v480_v1 = vmax.f32 %v466_v62, 0.0 }
 0x28e   : > { %v479_v3 = vmax.f32 %v461_v2, 0.0  ;;  %v732_v6 = vpop.f32.mrb[2].mxu1 }
 0x28f   : > { %v476_v7 = vadd.f32 %v732_v6, %v383_v4  ;;  %v470_v8 = vpop.f32.mrb[3].mxu1 }
 0x290   : > { %v761_v9 = vpack.c.bf16 %v480_v1, %v479_v3  ;;  %v471_v10 = vadd.f32 %v470_v8, %v379_v59 }
 0x291   : > { %v482_v11 = vmax.f32 %v476_v7, 0.0 }
 0x292   : > { %v481_v12 = vmax.f32 %v471_v10, 0.0  ;;  %762 = vmatpush3.bf16.msra.mxu0 %v761_v9 }
 0x293   : > { %763 = vmatprep.subr.bf16.mxu0 %v974_v55 }
 0x294   : > { %v764_v0 = vpack.c.bf16 %v482_v11, %v481_v12 }
 0x296   : > { %765 = vmatpush3.bf16.msra.mxu0 %v764_v0 }
 0x299   : > { %742 = vmatmul.mubr.msk.f32.vlgmr.msra.gmra.mrb[8].mxu0 %vm487_vm4, %v1154_v5 }
 0x36c   : > { %v556_v14 = vpop.f32.mrb[8].mxu0 }
 0x36d   : > { %v557_v15 = vadd.f32 %v556_v14, %v485_v13  ;;  %v743_v16 = vpop.f32.mrb[9].mxu0 }
 0x36f   : > { %560 = vst [vmem:[%s169_s26] sm:$0x1] %v557_v15 }
 0x370   : > { %908 = shalt.err (!%p905_p7)
}
 0x371   : > { %s909_s5 = scalar_lea.hbm %s1189_s28, 16  ;;  %s913_s18 = scalar_lea.hbm %s1235_s2, 32 }
 0x372   : > { %p910_p9 = scmp.ne.s32.totalorder %s1189_s28, %s909_s5  ;;  %p914_p0 = scmp.lt.u32.totalorder %s1189_s28, %s1235_s2 }
 0x373   : > { %p915_p1 = scmp.lt.u32.totalorder %s913_s18, %s909_s5  ;;  %p917_p4 = scmp.lt.u32.totalorder %s909_s5, %s1189_s28 }
 0x374   : > { %p911_p2 = pnand %p910_p9, %p1085_p12 }
 0x375   : > { %p916_p11 = por %p915_p1, %p914_p0 }
 0x376   : > { %p912_p5 = pneg %p911_p2 }
 0x377   : > { %p918_p6 = por %p917_p4, %p916_p11 }
 0x379   : > { %p919_p8 = pnand %p918_p6, %p912_p5 }
 0x37b   : > { %922 = shalt.err (!%p919_p8)
}
 0x37c   : > { %772 = dma.vmem_to_hbm [thread:$0]  (%p1085_p12), %s1191_s22, 16, %s1189_s28, %s562_s29  }
 0x37d PF: > { %s586_s20 = sand.u32 1, %s953_s9   ;;  %p1250_p10 = scmp.ne.s32.totalorder %s1240_s16, 0 }
 0x37e   : > { %p1251_p13 = scmp.ge.s32.totalorder %s965_s12, 2  ;;  %s587_s19 = scalar_lea.sflag [#allocation4], %s586_s20 }
 0x380   : > { %p783_p3 = pnand %p1251_p13, %p1250_p10 }
 0x382   : > { %948 = dma.done.wait (!%p783_p3), %s587_s19, 16  }
 0x383   : > { %950 = vsyncadd (!%p783_p3), %s587_s19, 4294967280  ;;  %p16_p7 = scmp.ge.s32.totalorder %s1050_s21, 4   ;;  %s1252_s9 = smov %s957_s10 }
 0x384   : > { %s1253_s10 = smov %s961_s11  ;;  %s1254_s11 = smov %s1081_s8 }
 0x385   : > { %s1255_s12 = smov %s1050_s21  ;;  %18 = sbr.rel (!%p16_p7) target bundleno = 6 (0x6), region = 77 }
 0x38c   :  { %591 = vsyncpa [#allocation3], 1 }
 0x38d   :  { %593 = vsyncpa [#allocation3 + $0x1], 1 }
 0x38e   :  { %594 = vsyncpa [#allocation6], 1 }
 0x38f   :  { %595 = vsyncpa [#allocation4], 1 }
 0x390   :  { %597 = vsyncpa [#allocation4 + $0x1], 1 }

</bundles_post_ra>
